<compile_context>
chip_gen: v5e
topology: v5e:2x2
jax: 0.10.0
libtpu: 0.0.40
codegen_flags: <defaults>
</compile_context>

<pallas_src>
import jax
import jax.numpy as jnp
import numpy as np
from jax.experimental import pallas as pl
from jax.experimental.pallas import tpu as pltpu


def _ginv_lstm_kernel(s_ref, winv_ref, bias_ref, wlin_ref, out_ref, h_ref, c_ref):
    """s_ref:    (T_CHUNK, B_pad, 1)  pooled input sums, time-major.
       winv_ref: (1, 4H)              fused GInvariant weights, gate order [i,f,o,g].
       bias_ref: (1, 4H)              fused bias  b_inv + b_lin.
       wlin_ref: (H, 4H)              fused recurrent weights, same gate order.
       out_ref:  (B_pad, H)           final hidden state (written on last chunk).
       h_ref/c_ref: VMEM scratch carrying the recurrent state across chunks."""
    t_chunk = s_ref.shape[0]
    H = wlin_ref.shape[0]

    @pl.when(pl.program_id(0) == 0)
    def _():
        h_ref[...] = jnp.zeros_like(h_ref)
        c_ref[...] = jnp.zeros_like(c_ref)

    winv = winv_ref[...]      # (1, 4H)
    bias = bias_ref[...]      # (1, 4H)
    w = wlin_ref[...]         # (H, 4H)

    def step(t, carry):
        h, c = carry
        s_t = s_ref[t]        # (B_pad, 1) -- sublane-aligned, no relayout
        # one fused MXU matmul per step + VPU broadcast + adds
        pre = s_t * winv + bias + jnp.dot(h, w, preferred_element_type=jnp.float32)
        # full-width EUP passes, lane slicing only afterwards
        sig = jax.nn.sigmoid(pre)     # (B_pad, 4H)
        tnh = jnp.tanh(pre)           # (B_pad, 4H)
        i = sig[:, 0 * H:1 * H]
        f = sig[:, 1 * H:2 * H]
        o = sig[:, 2 * H:3 * H]
        g = tnh[:, 3 * H:4 * H]
        c = f * c + i * g
        h = o * jnp.tanh(c)
        return h, c

    h_last, c_last = jax.lax.fori_loop(
        0, t_chunk, step, (h_ref[...], c_ref[...]), unroll=8)
    h_ref[...] = h_last
    c_ref[...] = c_last

    @pl.when(pl.program_id(0) == pl.num_programs(0) - 1)
    def _():
        out_ref[...] = h_last


def _pick_time_chunk(T, target=256):
    """Largest divisor of T that is <= target (keeps the grid exact)."""
    if T <= target:
        return T
    best = 1
    for c in range(1, target + 1):
        if T % c == 0:
            best = c
    return best


def ginv_lstm_forward(x, params, *, t_chunk=None):
    """x: (B, T, D) float32.  params: per-gate GInvariantLayer / Linear weights.
    Returns (hidden_dim, B), matching torch.swapdims(hidden_state, 0, 1)."""
    B, T, D = x.shape
    H = params["w_lin"]["i"].shape[0]

    # Fuse the 4 gates, order [i, f, o, g].
    order = ("i", "f", "o", "g")
    w_inv = jnp.concatenate([params["w_inv"][k] for k in order])[None, :]   # (1, 4H)
    b_inv = jnp.concatenate([params["b_inv"][k] for k in order])[None, :]   # (1, 4H)
    w_lin = jnp.concatenate([params["w_lin"][k] for k in order], axis=1)    # (H, 4H)
    b_lin = jnp.concatenate([params["b_lin"][k] for k in order])[None, :]   # (1, 4H)
    bias = (b_inv + b_lin).astype(jnp.float32)                              # (1, 4H)
    w_inv = w_inv.astype(jnp.float32)
    w_lin = w_lin.astype(jnp.float32)

    # G-invariant sum-pooling; transpose while the tensor is still tiny (B, T).
    s = jnp.sum(x.astype(jnp.float32), axis=-1)          # (B, T)
    s = jnp.swapaxes(s, 0, 1)                            # (T, B)  time-major
    b_pad = max(8, ((B + 7) // 8) * 8)                   # dense sublane tiles
    if b_pad != B:
        s = jnp.pad(s, ((0, 0), (0, b_pad - B)))
    s = s[:, :, None]                                    # (T, B_pad, 1)

    if t_chunk is None:
        t_chunk = _pick_time_chunk(T)
    num_chunks = T // t_chunk

    # VMEM budget from actual tile sizes (lane-padded estimates) + headroom,
    # capped so v7x's 64 MiB per-core VMEM keeps slack.
    lane = 128
    chunk_bytes = t_chunk * b_pad * lane * 4              # padded s chunk
    weight_bytes = (H * max(4 * H, lane) + 2 * 8 * max(4 * H, lane)) * 4
    state_bytes = 3 * b_pad * max(H, lane) * 4            # h, c scratch + out
    vmem_bytes = 2 * chunk_bytes + weight_bytes + state_bytes + (8 << 20)
    vmem_bytes = int(min(48 << 20, max(16 << 20, vmem_bytes)))

    h_last = pl.pallas_call(
        _ginv_lstm_kernel,
        out_shape=jax.ShapeDtypeStruct((b_pad, H), jnp.float32),
        grid_spec=pltpu.PrefetchScalarGridSpec(
            num_scalar_prefetch=0,
            grid=(num_chunks,),
            in_specs=[
                pl.BlockSpec((t_chunk, b_pad, 1), lambda c: (c, 0, 0)),  # s chunk
                pl.BlockSpec((1, 4 * H), lambda c: (0, 0)),              # w_inv
                pl.BlockSpec((1, 4 * H), lambda c: (0, 0)),              # bias
                pl.BlockSpec((H, 4 * H), lambda c: (0, 0)),              # w_lin
            ],
            out_specs=pl.BlockSpec((b_pad, H), lambda c: (0, 0)),
            scratch_shapes=[
                pltpu.VMEM((b_pad, H), jnp.float32),   # h carry
                pltpu.VMEM((b_pad, H), jnp.float32),   # c carry
            ],
        ),
        compiler_params=pltpu.CompilerParams(
            dimension_semantics=("arbitrary",),
            vmem_limit_bytes=vmem_bytes,
        ),
    )(s, w_inv, bias, w_lin)

    # torch: return torch.swapdims(hidden_state, 0, 1) -> (hidden_dim, B)
    return jnp.swapaxes(h_last[:B], 0, 1)


def ref_forward(x, params):
    """Pure-JAX reference of the same forward (per-gate, natural layout)."""
    H = params["w_lin"]["i"].shape[0]
    B = x.shape[0]
    h = jnp.zeros((B, H), jnp.float32)
    c = jnp.zeros((B, H), jnp.float32)
    x_tm = jnp.swapaxes(x, 0, 1)

    def pre(k, s, h):
        return (s * params["w_inv"][k][None, :] + params["b_inv"][k][None, :]
                + h @ params["w_lin"][k] + params["b_lin"][k][None, :])

    for t in range(x_tm.shape[0]):
        s = jnp.sum(x_tm[t], axis=-1, keepdims=True)
        i = jax.nn.sigmoid(pre("i", s, h))
        f = jax.nn.sigmoid(pre("f", s, h))
        g = jnp.tanh(pre("g", s, h))
        o = jax.nn.sigmoid(pre("o", s, h))
        c = f * c + i * g
        h = o * jnp.tanh(c)
    return h.T


if __name__ == "__main__":
    B, T, D, H = 2, 8, 16, 32   # batch, seq len, input_dim, hidden_dim

    key = jax.random.PRNGKey(0)
    keys = jax.random.split(key, 17)
    x = jax.random.normal(keys[0], (B, T, D), dtype=jnp.float32)

    gates = ("i", "f", "g", "o")
    bound = 1.0 / np.sqrt(H)
    params = {"w_inv": {}, "b_inv": {}, "w_lin": {}, "b_lin": {}}
    kidx = 1
    for k in gates:
        # GInvariantLayer params (sum-pooling invariant affine map).
        params["w_inv"][k] = 0.1 * jax.random.normal(keys[kidx], (H,),
                                                     dtype=jnp.float32); kidx += 1
        params["b_inv"][k] = 0.1 * jax.random.normal(keys[kidx], (H,),
                                                     dtype=jnp.float32); kidx += 1
        # nn.Linear(H, H) params, pre-transposed so the kernel computes h @ W.
        params["w_lin"][k] = jax.random.uniform(keys[kidx], (H, H),
                                                dtype=jnp.float32,
                                                minval=-bound, maxval=bound); kidx += 1
        params["b_lin"][k] = jax.random.uniform(keys[kidx], (H,),
                                                dtype=jnp.float32,
                                                minval=-bound, maxval=bound); kidx += 1

    out = ginv_lstm_forward(x, params)
    out = jax.block_until_ready(out)

    ref = ref_forward(x, params)
    np.testing.assert_allclose(np.asarray(out), np.asarray(ref),
                               rtol=1e-5, atol=1e-5)
    assert out.shape == (H, B)

    print("KERNEL_OK")
</pallas_src>

<mosaic_0001>
module attributes {stable_mosaic.version = 11 : i64} {
  func.func @_ginv_lstm_kernel(%arg0: i32, %arg1: memref<8x8x1xf32, #tpu.memory_space<vmem>>, %arg2: memref<1x128xf32, #tpu.memory_space<vmem>>, %arg3: memref<1x128xf32, #tpu.memory_space<vmem>>, %arg4: memref<32x128xf32, #tpu.memory_space<vmem>>, %arg5: memref<8x32xf32, #tpu.memory_space<vmem>>, %arg6: memref<8x32xf32, #tpu.memory_space<vmem>>, %arg7: memref<8x32xf32, #tpu.memory_space<vmem>>) attributes {dimension_semantics = [#tpu.dimension_semantics<arbitrary>], iteration_bounds = array<i64: 1>, scalar_prefetch = 0 : i64, scratch_operands = 2 : i64, tpu.core_type = #tpu.core_type<tc>, window_params = [{transform_indices = @transform_0, window_bounds = array<i64: 8, 8, 1>}, {pipeline_mode = #tpu.pipeline_mode<synchronous>, transform_indices = @transform_1, window_bounds = array<i64: 1, 128>}, {pipeline_mode = #tpu.pipeline_mode<synchronous>, transform_indices = @transform_2, window_bounds = array<i64: 1, 128>}, {pipeline_mode = #tpu.pipeline_mode<synchronous>, transform_indices = @transform_3, window_bounds = array<i64: 32, 128>}, {pipeline_mode = #tpu.pipeline_mode<synchronous>, transform_indices = @transform_4, window_bounds = array<i64: 8, 32>}]} {
    %c0_i32 = arith.constant 0 : i32
    %0 = arith.cmpi eq, %arg0, %c0_i32 : i32
    %1 = arith.extui %0 : i1 to i32
    %c0_i32_0 = arith.constant 0 : i32
    %2 = arith.cmpi ne, %1, %c0_i32_0 : i32
    scf.if %2 {
      %cst_48 = arith.constant 0.000000e+00 : f32
      %213 = vector.broadcast %cst_48 : f32 to vector<8x32xf32>
      %c0_49 = arith.constant 0 : index
      %c0_50 = arith.constant 0 : index
      %214 = vector.load %arg6[%c0_49, %c0_50] : memref<8x32xf32, #tpu.memory_space<vmem>>, vector<8x32xf32>
      tpu.vector_store %arg6[%c0_49, %c0_50], %213 {strides = array<i32>} : memref<8x32xf32, #tpu.memory_space<vmem>>, vector<8x32xf32>,
      %cst_51 = arith.constant 0.000000e+00 : f32
      %215 = vector.broadcast %cst_51 : f32 to vector<8x32xf32>
      %c0_52 = arith.constant 0 : index
      %c0_53 = arith.constant 0 : index
      %216 = vector.load %arg7[%c0_52, %c0_53] : memref<8x32xf32, #tpu.memory_space<vmem>>, vector<8x32xf32>
      tpu.vector_store %arg7[%c0_52, %c0_53], %215 {strides = array<i32>} : memref<8x32xf32, #tpu.memory_space<vmem>>, vector<8x32xf32>,
    } else {
    }
    %c0 = arith.constant 0 : index
    %c0_1 = arith.constant 0 : index
    %3 = vector.load %arg2[%c0, %c0_1] : memref<1x128xf32, #tpu.memory_space<vmem>>, vector<1x128xf32>
    %c0_2 = arith.constant 0 : index
    %c0_3 = arith.constant 0 : index
    %4 = vector.load %arg3[%c0_2, %c0_3] : memref<1x128xf32, #tpu.memory_space<vmem>>, vector<1x128xf32>
    %c0_4 = arith.constant 0 : index
    %c0_5 = arith.constant 0 : index
    %5 = vector.load %arg4[%c0_4, %c0_5] : memref<32x128xf32, #tpu.memory_space<vmem>>, vector<32x128xf32>
    %c0_6 = arith.constant 0 : index
    %c0_7 = arith.constant 0 : index
    %6 = vector.load %arg6[%c0_6, %c0_7] : memref<8x32xf32, #tpu.memory_space<vmem>>, vector<8x32xf32>
    %c0_8 = arith.constant 0 : index
    %c0_9 = arith.constant 0 : index
    %7 = vector.load %arg7[%c0_8, %c0_9] : memref<8x32xf32, #tpu.memory_space<vmem>>, vector<8x32xf32>
    %c0_i32_10 = arith.constant 0 : i32
    %8 = arith.index_cast %c0_i32_10 : i32 to index
    %c0_11 = arith.constant 0 : index
    %c0_12 = arith.constant 0 : index
    %9 = vector.load %arg1[%8, %c0_11, %c0_12] : memref<8x8x1xf32, #tpu.memory_space<vmem>>, vector<1x8x1xf32>
    %10 = vector.shape_cast %9 : vector<1x8x1xf32> to vector<8x1xf32>
    %11 = vector.broadcast %10 : vector<8x1xf32> to vector<8x128xf32>
    %12 = vector.broadcast %3 : vector<1x128xf32> to vector<8x128xf32>
    %13 = arith.mulf %11, %12 : vector<8x128xf32>
    %14 = vector.broadcast %4 : vector<1x128xf32> to vector<8x128xf32>
    %15 = arith.addf %13, %14 : vector<8x128xf32>
    %cst = arith.constant dense<0.000000e+00> : vector<8x128xf32>
    %16 = tpu.matmul %6, %5, %cst {dimension_numbers = #tpu.dot_dimension_numbers<[1], [0], [0], [1], [0, 0, 1, 1], [], []>} : vector<8x32xf32>, vector<32x128xf32>, vector<8x128xf32> -> vector<8x128xf32>
    %17 = arith.addf %15, %16 : vector<8x128xf32>
    %18 = arith.negf %17 : vector<8x128xf32>
    %19 = math.exp %18 : vector<8x128xf32>
    %cst_13 = arith.constant 1.000000e+00 : f32
    %20 = vector.broadcast %cst_13 : f32 to vector<8x128xf32>
    %21 = arith.addf %20, %19 : vector<8x128xf32>
    %22 = arith.divf %20, %21 : vector<8x128xf32>
    %23 = math.tanh %17 : vector<8x128xf32>
    %24 = vector.extract_strided_slice %22 {offsets = [0, 0], sizes = [8, 32], strides = [1, 1]} : vector<8x128xf32> to vector<8x32xf32>
    %25 = vector.extract_strided_slice %22 {offsets = [0, 32], sizes = [8, 32], strides = [1, 1]} : vector<8x128xf32> to vector<8x32xf32>
    %26 = vector.extract_strided_slice %22 {offsets = [0, 64], sizes = [8, 32], strides = [1, 1]} : vector<8x128xf32> to vector<8x32xf32>
    %27 = vector.extract_strided_slice %23 {offsets = [0, 96], sizes = [8, 32], strides = [1, 1]} : vector<8x128xf32> to vector<8x32xf32>
    %28 = arith.mulf %25, %7 : vector<8x32xf32>
    %29 = arith.mulf %24, %27 : vector<8x32xf32>
    %30 = arith.addf %28, %29 : vector<8x32xf32>
    %31 = math.tanh %30 : vector<8x32xf32>
    %32 = arith.mulf %26, %31 : vector<8x32xf32>
    %c1_i32 = arith.constant 1 : i32
    %33 = arith.index_cast %c1_i32 : i32 to index
    %c0_14 = arith.constant 0 : index
    %c0_15 = arith.constant 0 : index
    %34 = vector.load %arg1[%33, %c0_14, %c0_15] : memref<8x8x1xf32, #tpu.memory_space<vmem>>, vector<1x8x1xf32>
    %35 = vector.shape_cast %34 : vector<1x8x1xf32> to vector<8x1xf32>
    %36 = vector.broadcast %35 : vector<8x1xf32> to vector<8x128xf32>
    %37 = vector.broadcast %3 : vector<1x128xf32> to vector<8x128xf32>
    %38 = arith.mulf %36, %37 : vector<8x128xf32>
    %39 = vector.broadcast %4 : vector<1x128xf32> to vector<8x128xf32>
    %40 = arith.addf %38, %39 : vector<8x128xf32>
    %cst_16 = arith.constant dense<0.000000e+00> : vector<8x128xf32>
    %41 = tpu.matmul %32, %5, %cst_16 {dimension_numbers = #tpu.dot_dimension_numbers<[1], [0], [0], [1], [0, 0, 1, 1], [], []>} : vector<8x32xf32>, vector<32x128xf32>, vector<8x128xf32> -> vector<8x128xf32>
    %42 = arith.addf %40, %41 : vector<8x128xf32>
    %43 = arith.negf %42 : vector<8x128xf32>
    %44 = math.exp %43 : vector<8x128xf32>
    %cst_17 = arith.constant 1.000000e+00 : f32
    %45 = vector.broadcast %cst_17 : f32 to vector<8x128xf32>
    %46 = arith.addf %45, %44 : vector<8x128xf32>
    %47 = arith.divf %45, %46 : vector<8x128xf32>
    %48 = math.tanh %42 : vector<8x128xf32>
    %49 = vector.extract_strided_slice %47 {offsets = [0, 0], sizes = [8, 32], strides = [1, 1]} : vector<8x128xf32> to vector<8x32xf32>
    %50 = vector.extract_strided_slice %47 {offsets = [0, 32], sizes = [8, 32], strides = [1, 1]} : vector<8x128xf32> to vector<8x32xf32>
    %51 = vector.extract_strided_slice %47 {offsets = [0, 64], sizes = [8, 32], strides = [1, 1]} : vector<8x128xf32> to vector<8x32xf32>
    %52 = vector.extract_strided_slice %48 {offsets = [0, 96], sizes = [8, 32], strides = [1, 1]} : vector<8x128xf32> to vector<8x32xf32>
    %53 = arith.mulf %50, %30 : vector<8x32xf32>
    %54 = arith.mulf %49, %52 : vector<8x32xf32>
    %55 = arith.addf %53, %54 : vector<8x32xf32>
    %56 = math.tanh %55 : vector<8x32xf32>
    %57 = arith.mulf %51, %56 : vector<8x32xf32>
    %c2_i32 = arith.constant 2 : i32
    %58 = arith.index_cast %c2_i32 : i32 to index
    %c0_18 = arith.constant 0 : index
    %c0_19 = arith.constant 0 : index
    %59 = vector.load %arg1[%58, %c0_18, %c0_19] : memref<8x8x1xf32, #tpu.memory_space<vmem>>, vector<1x8x1xf32>
    %60 = vector.shape_cast %59 : vector<1x8x1xf32> to vector<8x1xf32>
    %61 = vector.broadcast %60 : vector<8x1xf32> to vector<8x128xf32>
    %62 = vector.broadcast %3 : vector<1x128xf32> to vector<8x128xf32>
    %63 = arith.mulf %61, %62 : vector<8x128xf32>
    %64 = vector.broadcast %4 : vector<1x128xf32> to vector<8x128xf32>
    %65 = arith.addf %63, %64 : vector<8x128xf32>
    %cst_20 = arith.constant dense<0.000000e+00> : vector<8x128xf32>
    %66 = tpu.matmul %57, %5, %cst_20 {dimension_numbers = #tpu.dot_dimension_numbers<[1], [0], [0], [1], [0, 0, 1, 1], [], []>} : vector<8x32xf32>, vector<32x128xf32>, vector<8x128xf32> -> vector<8x128xf32>
    %67 = arith.addf %65, %66 : vector<8x128xf32>
    %68 = arith.negf %67 : vector<8x128xf32>
    %69 = math.exp %68 : vector<8x128xf32>
    %cst_21 = arith.constant 1.000000e+00 : f32
    %70 = vector.broadcast %cst_21 : f32 to vector<8x128xf32>
    %71 = arith.addf %70, %69 : vector<8x128xf32>
    %72 = arith.divf %70, %71 : vector<8x128xf32>
    %73 = math.tanh %67 : vector<8x128xf32>
    %74 = vector.extract_strided_slice %72 {offsets = [0, 0], sizes = [8, 32], strides = [1, 1]} : vector<8x128xf32> to vector<8x32xf32>
    %75 = vector.extract_strided_slice %72 {offsets = [0, 32], sizes = [8, 32], strides = [1, 1]} : vector<8x128xf32> to vector<8x32xf32>
    %76 = vector.extract_strided_slice %72 {offsets = [0, 64], sizes = [8, 32], strides = [1, 1]} : vector<8x128xf32> to vector<8x32xf32>
    %77 = vector.extract_strided_slice %73 {offsets = [0, 96], sizes = [8, 32], strides = [1, 1]} : vector<8x128xf32> to vector<8x32xf32>
    %78 = arith.mulf %75, %55 : vector<8x32xf32>
    %79 = arith.mulf %74, %77 : vector<8x32xf32>
    %80 = arith.addf %78, %79 : vector<8x32xf32>
    %81 = math.tanh %80 : vector<8x32xf32>
    %82 = arith.mulf %76, %81 : vector<8x32xf32>
    %c3_i32 = arith.constant 3 : i32
    %83 = arith.index_cast %c3_i32 : i32 to index
    %c0_22 = arith.constant 0 : index
    %c0_23 = arith.constant 0 : index
    %84 = vector.load %arg1[%83, %c0_22, %c0_23] : memref<8x8x1xf32, #tpu.memory_space<vmem>>, vector<1x8x1xf32>
    %85 = vector.shape_cast %84 : vector<1x8x1xf32> to vector<8x1xf32>
    %86 = vector.broadcast %85 : vector<8x1xf32> to vector<8x128xf32>
    %87 = vector.broadcast %3 : vector<1x128xf32> to vector<8x128xf32>
    %88 = arith.mulf %86, %87 : vector<8x128xf32>
    %89 = vector.broadcast %4 : vector<1x128xf32> to vector<8x128xf32>
    %90 = arith.addf %88, %89 : vector<8x128xf32>
    %cst_24 = arith.constant dense<0.000000e+00> : vector<8x128xf32>
    %91 = tpu.matmul %82, %5, %cst_24 {dimension_numbers = #tpu.dot_dimension_numbers<[1], [0], [0], [1], [0, 0, 1, 1], [], []>} : vector<8x32xf32>, vector<32x128xf32>, vector<8x128xf32> -> vector<8x128xf32>
    %92 = arith.addf %90, %91 : vector<8x128xf32>
    %93 = arith.negf %92 : vector<8x128xf32>
    %94 = math.exp %93 : vector<8x128xf32>
    %cst_25 = arith.constant 1.000000e+00 : f32
    %95 = vector.broadcast %cst_25 : f32 to vector<8x128xf32>
    %96 = arith.addf %95, %94 : vector<8x128xf32>
    %97 = arith.divf %95, %96 : vector<8x128xf32>
    %98 = math.tanh %92 : vector<8x128xf32>
    %99 = vector.extract_strided_slice %97 {offsets = [0, 0], sizes = [8, 32], strides = [1, 1]} : vector<8x128xf32> to vector<8x32xf32>
    %100 = vector.extract_strided_slice %97 {offsets = [0, 32], sizes = [8, 32], strides = [1, 1]} : vector<8x128xf32> to vector<8x32xf32>
    %101 = vector.extract_strided_slice %97 {offsets = [0, 64], sizes = [8, 32], strides = [1, 1]} : vector<8x128xf32> to vector<8x32xf32>
    %102 = vector.extract_strided_slice %98 {offsets = [0, 96], sizes = [8, 32], strides = [1, 1]} : vector<8x128xf32> to vector<8x32xf32>
    %103 = arith.mulf %100, %80 : vector<8x32xf32>
    %104 = arith.mulf %99, %102 : vector<8x32xf32>
    %105 = arith.addf %103, %104 : vector<8x32xf32>
    %106 = math.tanh %105 : vector<8x32xf32>
    %107 = arith.mulf %101, %106 : vector<8x32xf32>
    %c4_i32 = arith.constant 4 : i32
    %108 = arith.index_cast %c4_i32 : i32 to index
    %c0_26 = arith.constant 0 : index
    %c0_27 = arith.constant 0 : index
    %109 = vector.load %arg1[%108, %c0_26, %c0_27] : memref<8x8x1xf32, #tpu.memory_space<vmem>>, vector<1x8x1xf32>
    %110 = vector.shape_cast %109 : vector<1x8x1xf32> to vector<8x1xf32>
    %111 = vector.broadcast %110 : vector<8x1xf32> to vector<8x128xf32>
    %112 = vector.broadcast %3 : vector<1x128xf32> to vector<8x128xf32>
    %113 = arith.mulf %111, %112 : vector<8x128xf32>
    %114 = vector.broadcast %4 : vector<1x128xf32> to vector<8x128xf32>
    %115 = arith.addf %113, %114 : vector<8x128xf32>
    %cst_28 = arith.constant dense<0.000000e+00> : vector<8x128xf32>
    %116 = tpu.matmul %107, %5, %cst_28 {dimension_numbers = #tpu.dot_dimension_numbers<[1], [0], [0], [1], [0, 0, 1, 1], [], []>} : vector<8x32xf32>, vector<32x128xf32>, vector<8x128xf32> -> vector<8x128xf32>
    %117 = arith.addf %115, %116 : vector<8x128xf32>
    %118 = arith.negf %117 : vector<8x128xf32>
    %119 = math.exp %118 : vector<8x128xf32>
    %cst_29 = arith.constant 1.000000e+00 : f32
    %120 = vector.broadcast %cst_29 : f32 to vector<8x128xf32>
    %121 = arith.addf %120, %119 : vector<8x128xf32>
    %122 = arith.divf %120, %121 : vector<8x128xf32>
    %123 = math.tanh %117 : vector<8x128xf32>
    %124 = vector.extract_strided_slice %122 {offsets = [0, 0], sizes = [8, 32], strides = [1, 1]} : vector<8x128xf32> to vector<8x32xf32>
    %125 = vector.extract_strided_slice %122 {offsets = [0, 32], sizes = [8, 32], strides = [1, 1]} : vector<8x128xf32> to vector<8x32xf32>
    %126 = vector.extract_strided_slice %122 {offsets = [0, 64], sizes = [8, 32], strides = [1, 1]} : vector<8x128xf32> to vector<8x32xf32>
    %127 = vector.extract_strided_slice %123 {offsets = [0, 96], sizes = [8, 32], strides = [1, 1]} : vector<8x128xf32> to vector<8x32xf32>
    %128 = arith.mulf %125, %105 : vector<8x32xf32>
    %129 = arith.mulf %124, %127 : vector<8x32xf32>
    %130 = arith.addf %128, %129 : vector<8x32xf32>
    %131 = math.tanh %130 : vector<8x32xf32>
    %132 = arith.mulf %126, %131 : vector<8x32xf32>
    %c5_i32 = arith.constant 5 : i32
    %133 = arith.index_cast %c5_i32 : i32 to index
    %c0_30 = arith.constant 0 : index
    %c0_31 = arith.constant 0 : index
    %134 = vector.load %arg1[%133, %c0_30, %c0_31] : memref<8x8x1xf32, #tpu.memory_space<vmem>>, vector<1x8x1xf32>
    %135 = vector.shape_cast %134 : vector<1x8x1xf32> to vector<8x1xf32>
    %136 = vector.broadcast %135 : vector<8x1xf32> to vector<8x128xf32>
    %137 = vector.broadcast %3 : vector<1x128xf32> to vector<8x128xf32>
    %138 = arith.mulf %136, %137 : vector<8x128xf32>
    %139 = vector.broadcast %4 : vector<1x128xf32> to vector<8x128xf32>
    %140 = arith.addf %138, %139 : vector<8x128xf32>
    %cst_32 = arith.constant dense<0.000000e+00> : vector<8x128xf32>
    %141 = tpu.matmul %132, %5, %cst_32 {dimension_numbers = #tpu.dot_dimension_numbers<[1], [0], [0], [1], [0, 0, 1, 1], [], []>} : vector<8x32xf32>, vector<32x128xf32>, vector<8x128xf32> -> vector<8x128xf32>
    %142 = arith.addf %140, %141 : vector<8x128xf32>
    %143 = arith.negf %142 : vector<8x128xf32>
    %144 = math.exp %143 : vector<8x128xf32>
    %cst_33 = arith.constant 1.000000e+00 : f32
    %145 = vector.broadcast %cst_33 : f32 to vector<8x128xf32>
    %146 = arith.addf %145, %144 : vector<8x128xf32>
    %147 = arith.divf %145, %146 : vector<8x128xf32>
    %148 = math.tanh %142 : vector<8x128xf32>
    %149 = vector.extract_strided_slice %147 {offsets = [0, 0], sizes = [8, 32], strides = [1, 1]} : vector<8x128xf32> to vector<8x32xf32>
    %150 = vector.extract_strided_slice %147 {offsets = [0, 32], sizes = [8, 32], strides = [1, 1]} : vector<8x128xf32> to vector<8x32xf32>
    %151 = vector.extract_strided_slice %147 {offsets = [0, 64], sizes = [8, 32], strides = [1, 1]} : vector<8x128xf32> to vector<8x32xf32>
    %152 = vector.extract_strided_slice %148 {offsets = [0, 96], sizes = [8, 32], strides = [1, 1]} : vector<8x128xf32> to vector<8x32xf32>
    %153 = arith.mulf %150, %130 : vector<8x32xf32>
    %154 = arith.mulf %149, %152 : vector<8x32xf32>
    %155 = arith.addf %153, %154 : vector<8x32xf32>
    %156 = math.tanh %155 : vector<8x32xf32>
    %157 = arith.mulf %151, %156 : vector<8x32xf32>
    %c6_i32 = arith.constant 6 : i32
    %158 = arith.index_cast %c6_i32 : i32 to index
    %c0_34 = arith.constant 0 : index
    %c0_35 = arith.constant 0 : index
    %159 = vector.load %arg1[%158, %c0_34, %c0_35] : memref<8x8x1xf32, #tpu.memory_space<vmem>>, vector<1x8x1xf32>
    %160 = vector.shape_cast %159 : vector<1x8x1xf32> to vector<8x1xf32>
    %161 = vector.broadcast %160 : vector<8x1xf32> to vector<8x128xf32>
    %162 = vector.broadcast %3 : vector<1x128xf32> to vector<8x128xf32>
    %163 = arith.mulf %161, %162 : vector<8x128xf32>
    %164 = vector.broadcast %4 : vector<1x128xf32> to vector<8x128xf32>
    %165 = arith.addf %163, %164 : vector<8x128xf32>
    %cst_36 = arith.constant dense<0.000000e+00> : vector<8x128xf32>
    %166 = tpu.matmul %157, %5, %cst_36 {dimension_numbers = #tpu.dot_dimension_numbers<[1], [0], [0], [1], [0, 0, 1, 1], [], []>} : vector<8x32xf32>, vector<32x128xf32>, vector<8x128xf32> -> vector<8x128xf32>
    %167 = arith.addf %165, %166 : vector<8x128xf32>
    %168 = arith.negf %167 : vector<8x128xf32>
    %169 = math.exp %168 : vector<8x128xf32>
    %cst_37 = arith.constant 1.000000e+00 : f32
    %170 = vector.broadcast %cst_37 : f32 to vector<8x128xf32>
    %171 = arith.addf %170, %169 : vector<8x128xf32>
    %172 = arith.divf %170, %171 : vector<8x128xf32>
    %173 = math.tanh %167 : vector<8x128xf32>
    %174 = vector.extract_strided_slice %172 {offsets = [0, 0], sizes = [8, 32], strides = [1, 1]} : vector<8x128xf32> to vector<8x32xf32>
    %175 = vector.extract_strided_slice %172 {offsets = [0, 32], sizes = [8, 32], strides = [1, 1]} : vector<8x128xf32> to vector<8x32xf32>
    %176 = vector.extract_strided_slice %172 {offsets = [0, 64], sizes = [8, 32], strides = [1, 1]} : vector<8x128xf32> to vector<8x32xf32>
    %177 = vector.extract_strided_slice %173 {offsets = [0, 96], sizes = [8, 32], strides = [1, 1]} : vector<8x128xf32> to vector<8x32xf32>
    %178 = arith.mulf %175, %155 : vector<8x32xf32>
    %179 = arith.mulf %174, %177 : vector<8x32xf32>
    %180 = arith.addf %178, %179 : vector<8x32xf32>
    %181 = math.tanh %180 : vector<8x32xf32>
    %182 = arith.mulf %176, %181 : vector<8x32xf32>
    %c7_i32 = arith.constant 7 : i32
    %183 = arith.index_cast %c7_i32 : i32 to index
    %c0_38 = arith.constant 0 : index
    %c0_39 = arith.constant 0 : index
    %184 = vector.load %arg1[%183, %c0_38, %c0_39] : memref<8x8x1xf32, #tpu.memory_space<vmem>>, vector<1x8x1xf32>
    %185 = vector.shape_cast %184 : vector<1x8x1xf32> to vector<8x1xf32>
    %186 = vector.broadcast %185 : vector<8x1xf32> to vector<8x128xf32>
    %187 = vector.broadcast %3 : vector<1x128xf32> to vector<8x128xf32>
    %188 = arith.mulf %186, %187 : vector<8x128xf32>
    %189 = vector.broadcast %4 : vector<1x128xf32> to vector<8x128xf32>
    %190 = arith.addf %188, %189 : vector<8x128xf32>
    %cst_40 = arith.constant dense<0.000000e+00> : vector<8x128xf32>
    %191 = tpu.matmul %182, %5, %cst_40 {dimension_numbers = #tpu.dot_dimension_numbers<[1], [0], [0], [1], [0, 0, 1, 1], [], []>} : vector<8x32xf32>, vector<32x128xf32>, vector<8x128xf32> -> vector<8x128xf32>
    %192 = arith.addf %190, %191 : vector<8x128xf32>
    %193 = arith.negf %192 : vector<8x128xf32>
    %194 = math.exp %193 : vector<8x128xf32>
    %cst_41 = arith.constant 1.000000e+00 : f32
    %195 = vector.broadcast %cst_41 : f32 to vector<8x128xf32>
    %196 = arith.addf %195, %194 : vector<8x128xf32>
    %197 = arith.divf %195, %196 : vector<8x128xf32>
    %198 = math.tanh %192 : vector<8x128xf32>
    %199 = vector.extract_strided_slice %197 {offsets = [0, 0], sizes = [8, 32], strides = [1, 1]} : vector<8x128xf32> to vector<8x32xf32>
    %200 = vector.extract_strided_slice %197 {offsets = [0, 32], sizes = [8, 32], strides = [1, 1]} : vector<8x128xf32> to vector<8x32xf32>
    %201 = vector.extract_strided_slice %197 {offsets = [0, 64], sizes = [8, 32], strides = [1, 1]} : vector<8x128xf32> to vector<8x32xf32>
    %202 = vector.extract_strided_slice %198 {offsets = [0, 96], sizes = [8, 32], strides = [1, 1]} : vector<8x128xf32> to vector<8x32xf32>
    %203 = arith.mulf %200, %180 : vector<8x32xf32>
    %204 = arith.mulf %199, %202 : vector<8x32xf32>
    %205 = arith.addf %203, %204 : vector<8x32xf32>
    %206 = math.tanh %205 : vector<8x32xf32>
    %207 = arith.mulf %201, %206 : vector<8x32xf32>
    %c8_i32 = arith.constant 8 : i32
    %c0_42 = arith.constant 0 : index
    %c0_43 = arith.constant 0 : index
    %208 = vector.load %arg6[%c0_42, %c0_43] : memref<8x32xf32, #tpu.memory_space<vmem>>, vector<8x32xf32>
    tpu.vector_store %arg6[%c0_42, %c0_43], %207 {strides = array<i32>} : memref<8x32xf32, #tpu.memory_space<vmem>>, vector<8x32xf32>,
    %c0_44 = arith.constant 0 : index
    %c0_45 = arith.constant 0 : index
    %209 = vector.load %arg7[%c0_44, %c0_45] : memref<8x32xf32, #tpu.memory_space<vmem>>, vector<8x32xf32>
    tpu.vector_store %arg7[%c0_44, %c0_45], %205 {strides = array<i32>} : memref<8x32xf32, #tpu.memory_space<vmem>>, vector<8x32xf32>,
    %c0_i32_46 = arith.constant 0 : i32
    %210 = arith.cmpi eq, %arg0, %c0_i32_46 : i32
    %211 = arith.extui %210 : i1 to i32
    %c0_i32_47 = arith.constant 0 : i32
    %212 = arith.cmpi ne, %211, %c0_i32_47 : i32
    scf.if %212 {
      %c0_48 = arith.constant 0 : index
      %c0_49 = arith.constant 0 : index
      %213 = vector.load %arg5[%c0_48, %c0_49] : memref<8x32xf32, #tpu.memory_space<vmem>>, vector<8x32xf32>
      tpu.vector_store %arg5[%c0_48, %c0_49], %207 {strides = array<i32>} : memref<8x32xf32, #tpu.memory_space<vmem>>, vector<8x32xf32>,
    } else {
    }
    return
  }
  func.func @transform_0(%arg0: i32) -> (i32, i32, i32) {
    %c0_i32 = arith.constant 0 : i32
    %c0_i32_0 = arith.constant 0 : i32
    %c0_i32_1 = arith.constant 0 : i32
    return %arg0, %c0_i32, %c0_i32_0 : i32, i32, i32
  }
  func.func @transform_1(%arg0: i32) -> (i32, i32) {
    %c0_i32 = arith.constant 0 : i32
    %c0_i32_0 = arith.constant 0 : i32
    %c0_i32_1 = arith.constant 0 : i32
    return %c0_i32, %c0_i32_0 : i32, i32
  }
  func.func @transform_2(%arg0: i32) -> (i32, i32) {
    %c0_i32 = arith.constant 0 : i32
    %c0_i32_0 = arith.constant 0 : i32
    %c0_i32_1 = arith.constant 0 : i32
    return %c0_i32, %c0_i32_0 : i32, i32
  }
  func.func @transform_3(%arg0: i32) -> (i32, i32) {
    %c0_i32 = arith.constant 0 : i32
    %c0_i32_0 = arith.constant 0 : i32
    %c0_i32_1 = arith.constant 0 : i32
    return %c0_i32, %c0_i32_0 : i32, i32
  }
  func.func @transform_4(%arg0: i32) -> (i32, i32) {
    %c0_i32 = arith.constant 0 : i32
    %c0_i32_0 = arith.constant 0 : i32
    %c0_i32_1 = arith.constant 0 : i32
    return %c0_i32, %c0_i32_0 : i32, i32
  }
}

</mosaic_0001>

<bundles_post_ra>
// kernel: tpu_custom_call.1
= control target key start
LH: loop header
LB: loop body
LE: loop exit
PB: predicated region body
PF: predicated region fallthrough
CT: control target
= control target key end

     0   :  { %vm22_vm0 = vcmask 261120   ;;  %v771_v2 = vmov 0.0   ;;  %v772_v3 = vmov 0   ;;  %s913_s0 = inlined_call_operand.vmem [shape: f32[8,8,1], index: 0, kind: input, shape index: {}]   ;;  %s914_s1 = inlined_call_operand.vmem [shape: f32[1,128], index: 1, kind: input, shape index: {}]   ;;  %s915_s2 = inlined_call_operand.vmem [shape: f32[1,128], index: 2, kind: input, shape index: {}]   ;;  %s916_s3 = inlined_call_operand.vmem [shape: f32[32,128], index: 3, kind: input, shape index: {}]   ;;  %s917_s4 = inlined_call_operand.hbm [shape: f32[8,32], index: 4, kind: output, shape index: {}]  }
   0x1   :  { %v30_v0 = vld [vmem:[%s916_s3 + $0x18] sm:$0xff]  ;;  %v29_v1 = vld [vmem:[%s916_s3 + $0x10] sm:$0xff]  ;;  %23 = vst.msk [vmem:[#allocation2] sm:$0xff] %vm22_vm0, %v771_v2  ;;  %676 = vset.pattern.permute.xlu0 %v772_v3  ;;  %v33_v4 = vld [vmem:[%s913_s0] sm:$0xff] }
   0x2   :  { %63 = vmatpush.msra.mxu0 %v30_v0  ;;  %v28_v5 = vld [vmem:[%s916_s3 + $0x8] sm:$0xff]  ;;  %24 = vst.msk [vmem:[#allocation3] sm:$0xff] %vm22_vm0, %v771_v2  ;;  %36 = vperm.xlu0 %676, %v33_v4  }
   0x3   :  { %139 = vmatpush.msra.mxu1 %v30_v0 }
   0x4   :  { %9 = vsyncpa [#allocation5], 0  ;;  %64 = vmatpush.msra.mxu0 %v29_v1  ;;  %211 = vmatpush.msra.mxu2 %v30_v0  ;;  %v27_v6 = vld [vmem:[%s916_s3] sm:$0xff]  ;;  %s773_s25 = smov 32   ;;  %v649_v17 = vld [vmem:[%s913_s0 + $0x8] sm:$0xff]  ;;  %s776_s16 = smov [#allocation4]  }
   0x5   :  { %140 = vmatpush.msra.mxu1 %v29_v1  ;;  %677 = vset.pattern.permute.xlu2 %v772_v3  ;;  %v824_v9 = vld [vmem:[%s914_s1] ss:$0 sm:$0xff]  ;;  %s774_s1 = smov 64   ;;  %v652_v4 = vld [vmem:[%s913_s0 + $0x10] sm:$0xff]  ;;  %s636_s17 = sshll.u32 %s776_s16, 4  ;;  %s637_s17 = int_to_ptr.vmem [resolvable:$true] %s636_s17 }
   0x6   :  { %65 = vmatpush.msra.mxu0 %v28_v5  ;;  %212 = vmatpush.msra.mxu2 %v29_v1  ;;  %v830_v12 = vld [vmem:[%s915_s2] ss:$0 sm:$0xff]  ;;  %s638_s20 = sshll.u32 %s917_s4, 4  ;;  %s639_s20 = int_to_ptr.hbm [resolvable:$true] %s638_s20 }
   0x7   :  { %141 = vmatpush.msra.mxu1 %v28_v5  ;;  %283 = vmatpush.msra.mxu3 %v30_v0 }
   0x8   :  { %66 = vmatpush.msra.mxu0 %v27_v6  ;;  %213 = vmatpush.msra.mxu2 %v28_v5  ;;  %v31_v7 = vld [vmem:[#allocation2] sm:$0xff] }
   0x9   :  { %142 = vmatpush.msra.mxu1 %v27_v6  ;;  %284 = vmatpush.msra.mxu3 %v29_v1  ;;  %v32_v8 = vld [vmem:[#allocation3] sm:$0xff] }
   0xa   :  { %647 = vmatmul.msk.f32.vlgmr.msra.gmra.mxu0 %vm22_vm0, %v31_v7  ;;  %214 = vmatpush.msra.mxu2 %v27_v6 }
   0xb   :  { %93 = vrot.lane.b32.xlu1 %v32_v8, %s773_s25  ;;  %285 = vmatpush.msra.mxu3 %v28_v5 }
   0xc   :  { %678 = vset.pattern.permute.xlu1 %v772_v3  ;;  %355 = vmatpush.msrb.mxu0 %v30_v0 }
   0xd   :  { %286 = vmatpush.msra.mxu3 %v27_v6  ;;  %427 = vmatpush.msrb.mxu1 %v30_v0 }
   0xe   :  { %356 = vmatpush.msrb.mxu0 %v29_v1  ;;  %499 = vmatpush.msrb.mxu2 %v30_v0 }
   0xf   :  { %428 = vmatpush.msrb.mxu1 %v29_v1  ;;  %571 = vmatpush.msrb.mxu3 %v30_v0 }
  0x10   :  { %357 = vmatpush.msrb.mxu0 %v28_v5  ;;  %500 = vmatpush.msrb.mxu2 %v29_v1 }
  0x11   :  { %429 = vmatpush.msrb.mxu1 %v28_v5  ;;  %572 = vmatpush.msrb.mxu3 %v29_v1 }
  0x12   :  { %358 = vmatpush.msrb.mxu0 %v27_v6  ;;  %501 = vmatpush.msrb.mxu2 %v28_v5 }
  0x13   :  { %430 = vmatpush.msrb.mxu1 %v27_v6  ;;  %573 = vmatpush.msrb.mxu3 %v28_v5 }
  0x14   :  { %502 = vmatpush.msrb.mxu2 %v27_v6 }
  0x15   :  { %574 = vmatpush.msrb.mxu3 %v27_v6 }
  0x74   :  { %v37_v10 = vpop.permute.xlu0 %36 }
  0x75   :  { %v42_v11 = vmul.f32 %v824_v9, %v37_v10 }
  0x77   :  { %v46_v13 = vadd.f32 %v830_v12, %v42_v11 }
  0x7d   :  { %v94_v33 = vpop.permute.xlu1 %93 }
  0x87   :  { %v68_v14 = vpop.f32.mrf.mxu0 }
  0x88   :  { %v71_v15 = vadd.f32 %v68_v14, %v46_v13 }
  0x8a   :  { %681 = vtanh.f32 %v71_v15  ;;  %v648_v18 = vmul.f32 -1.442695, %v71_v15 }
  0x8c   :  { %683 = vpow2.f32 %v648_v18 }
  0x90   :  { %v682_v16 = vpop.eup %681 }
  0x91   :  { %98 = vrot.lane.b32.xlu0 %v682_v16, %s773_s25 }
  0x92   :  { %v684_v19 = vpop.eup %683 }
  0x93   :  { %v75_v20 = vadd.f32 1.0, %v684_v19 }
  0x95   :  { %685 = vrcp.f32 %v75_v20  ;;  %v87_v26 = vand.u32 2147483648, %v75_v20  ;;  %vm81_vm2 = vweird.f32 %v75_v20  ;;  %v85_v27 = vand.u32 2147483647, %v75_v20 }
  0x97   :  { %v88_v29 = vor.u32 1.1754944e-38, %v87_v26  ;;  %vm86_vm4 = vcmp.eq.f32.partialorder %v85_v27, 8.507059e+37 }
  0x99   :  { %117 = vperm.xlu0 %676, %v649_v17  }
  0x9b   :  { %v686_v21 = vpop.eup %685 }
  0x9c   :  { %v77_v22 = vmul.f32 %v686_v21, %v75_v20  ;;  %vm82_vm1 = vweird.f32 %v686_v21 }
  0x9d   :  { %vm83_vm3 = vmor %vm81_vm2, %vm82_vm1 }
  0x9e   :  { %v78_v23 = vsub.f32 1.0, %v77_v22 }
  0xa0   :  { %v79_v24 = vmul.f32 %v686_v21, %v78_v23 }
  0xa2   :  { %v80_v25 = vadd.f32 %v686_v21, %v79_v24 }
  0xa4   :  { %v84_v28 = vsel %vm83_vm3, %v686_v21, %v80_v25 }
  0xa5   :  { %v89_v30 = vsel %vm86_vm4, %v88_v29, %v84_v28 }
  0xa6   :  { %v96_v34 = vmul.f32 %v94_v33, %v89_v30 }
 0x103   :  { %v99_v31 = vpop.permute.xlu0 %98 }
 0x104   :  { %v101_v32 = vmul.f32 %v99_v31, %v89_v30 }
 0x106   :  { %103 = vrot.lane.b32.xlu1 %v101_v32, %s773_s25 }
 0x10b   :  { %v118_v41 = vpop.permute.xlu0 %117 }
 0x10c   :  { %v120_v42 = vmul.f32 %v824_v9, %v118_v41 }
 0x10e   :  { %v121_v43 = vadd.f32 %v830_v12, %v120_v42 }
 0x178   :  { %v104_v35 = vpop.permute.xlu1 %103 }
 0x179   :  { %v106_v36 = vadd.f32 %v104_v35, %v96_v34  ;;  %v655_v35 = vld [vmem:[%s913_s0 + $0x18] sm:$0xff] }
 0x17b   :  { %687 = vtanh.f32 %v106_v36 }
 0x181   :  { %v688_v37 = vpop.eup %687 }
 0x182   :  { %109 = vrot.lane.b32.xlu2 %v688_v37, %s773_s25 }
 0x1dc   :  { %v110_v38 = vpop.permute.xlu2 %109 }
 0x1dd   :  { %v112_v39 = vmul.f32 %v110_v38, %v89_v30 }
 0x1df   :  { %123 = vrot.lane.b32.xlu2 %v112_v39, %s774_s1 }
 0x239   :  { %v124_v40 = vpop.permute.xlu2 %123 }
 0x23a   :  { %650 = vmatmul.msk.f32.vlgmr.msra.gmra.mxu1 %vm22_vm0, %v124_v40 }
 0x2b7   :  { %v144_v44 = vpop.f32.mrf.mxu1 }
 0x2b8   :  { %v147_v45 = vadd.f32 %v144_v44, %v121_v43 }
 0x2ba   :  { %689 = vtanh.f32 %v147_v45  ;;  %v651_v47 = vmul.f32 -1.442695, %v147_v45 }
 0x2bc   :  { %691 = vpow2.f32 %v651_v47 }
 0x2c0   :  { %v690_v46 = vpop.eup %689 }
 0x2c1   :  { %170 = vrot.lane.b32.xlu1 %v690_v46, %s773_s25 }
 0x2c2   :  { %v692_v48 = vpop.eup %691 }
 0x2c3   :  { %v151_v49 = vadd.f32 1.0, %v692_v48 }
 0x2c5   :  { %693 = vrcp.f32 %v151_v49  ;;  %v163_v55 = vand.u32 2147483648, %v151_v49  ;;  %vm157_vm6 = vweird.f32 %v151_v49  ;;  %v161_v56 = vand.u32 2147483647, %v151_v49 }
 0x2c7   :  { %v164_v58 = vor.u32 1.1754944e-38, %v163_v55  ;;  %vm162_vm8 = vcmp.eq.f32.partialorder %v161_v56, 8.507059e+37 }
 0x2cb   :  { %v694_v50 = vpop.eup %693 }
 0x2cc   :  { %v153_v51 = vmul.f32 %v694_v50, %v151_v49  ;;  %vm158_vm5 = vweird.f32 %v694_v50 }
 0x2cd   :  { %vm159_vm7 = vmor %vm157_vm6, %vm158_vm5 }
 0x2ce   :  { %v154_v52 = vsub.f32 1.0, %v153_v51 }
 0x2d0   :  { %v155_v53 = vmul.f32 %v694_v50, %v154_v52 }
 0x2d2   :  { %v156_v54 = vadd.f32 %v694_v50, %v155_v53 }
 0x2d4   :  { %v160_v57 = vsel %vm159_vm7, %v694_v50, %v156_v54 }
 0x2d5   :  { %v165_v60 = vsel %vm162_vm8, %v164_v58, %v160_v57  ;;  %v658_v58 = vld [vmem:[%s913_s0 + $0x20] sm:$0xff] }
 0x2d6   :  { %v168_v62 = vmul.f32 %v165_v60, %v106_v36 }
 0x333   :  { %v171_v59 = vpop.permute.xlu1 %170 }
 0x334   :  { %v173_v61 = vmul.f32 %v171_v59, %v165_v60 }
 0x336   :  { %175 = vrot.lane.b32.xlu2 %v173_v61, %s773_s25 }
 0x33e   :  { %189 = vperm.xlu2 %677, %v652_v4  }
 0x390   :  { %v176_v63 = vpop.permute.xlu2 %175 }
 0x391   :  { %v178_v0 = vadd.f32 %v176_v63, %v168_v62 }
 0x393   :  { %695 = vtanh.f32 %v178_v0 }
 0x398   :  { %v190_v6 = vpop.permute.xlu2 %189 }
 0x399   :  { %v696_v1 = vpop.eup %695  ;;  %v192_v7 = vmul.f32 %v824_v9, %v190_v6 }
 0x39a   :  { %181 = vrot.lane.b32.xlu0 %v696_v1, %s773_s25 }
 0x39b   :  { %v193_v8 = vadd.f32 %v830_v12, %v192_v7 }
 0x40c   :  { %v182_v2 = vpop.permute.xlu0 %181 }
 0x40d   :  { %v184_v3 = vmul.f32 %v182_v2, %v165_v60 }
 0x40f   :  { %195 = vrot.lane.b32.xlu1 %v184_v3, %s774_s1 }
 0x481   :  { %v196_v5 = vpop.permute.xlu1 %195 }
 0x482   :  { %653 = vmatmul.msk.f32.vlgmr.msra.gmra.mxu2 %vm22_vm0, %v196_v5 }
 0x505   :  { %v216_v10 = vpop.f32.mrf.mxu2 }
 0x506   :  { %v219_v11 = vadd.f32 %v216_v10, %v193_v8 }
 0x508   :  { %697 = vtanh.f32 %v219_v11  ;;  %v654_v14 = vmul.f32 -1.442695, %v219_v11 }
 0x50a   :  { %699 = vpow2.f32 %v654_v14 }
 0x50e   :  { %v698_v13 = vpop.eup %697 }
 0x50f   :  { %242 = vrot.lane.b32.xlu0 %v698_v13, %s773_s25 }
 0x510   :  { %v700_v15 = vpop.eup %699 }
 0x511   :  { %v223_v16 = vadd.f32 1.0, %v700_v15 }
 0x513   :  { %701 = vrcp.f32 %v223_v16  ;;  %v235_v22 = vand.u32 2147483648, %v223_v16  ;;  %vm229_vm10 = vweird.f32 %v223_v16  ;;  %v233_v23 = vand.u32 2147483647, %v223_v16 }
 0x515   :  { %v236_v25 = vor.u32 1.1754944e-38, %v235_v22  ;;  %vm234_vm12 = vcmp.eq.f32.partialorder %v233_v23, 8.507059e+37 }
 0x519   :  { %v702_v17 = vpop.eup %701 }
 0x51a   :  { %v225_v18 = vmul.f32 %v702_v17, %v223_v16  ;;  %vm230_vm9 = vweird.f32 %v702_v17 }
 0x51b   :  { %vm231_vm11 = vmor %vm229_vm10, %vm230_vm9 }
 0x51c   :  { %v226_v19 = vsub.f32 1.0, %v225_v18 }
 0x51e   :  { %v227_v20 = vmul.f32 %v702_v17, %v226_v19 }
 0x520   :  { %v228_v21 = vadd.f32 %v702_v17, %v227_v20 }
 0x522   :  { %v232_v24 = vsel %vm231_vm11, %v702_v17, %v228_v21 }
 0x523   :  { %v237_v27 = vsel %vm234_vm12, %v236_v25, %v232_v24  ;;  %v661_v25 = vld [vmem:[%s913_s0 + $0x28] sm:$0xff] }
 0x524   :  { %v240_v29 = vmul.f32 %v237_v27, %v178_v0 }
 0x581   :  { %v243_v26 = vpop.permute.xlu0 %242 }
 0x582   :  { %v245_v28 = vmul.f32 %v243_v26, %v237_v27 }
 0x584   :  { %247 = vrot.lane.b32.xlu1 %v245_v28, %s773_s25 }
 0x58c   :  { %261 = vperm.xlu1 %678, %v655_v35  }
 0x5f6   :  { %v248_v30 = vpop.permute.xlu1 %247 }
 0x5f7   :  { %v250_v31 = vadd.f32 %v248_v30, %v240_v29 }
 0x5f9   :  { %703 = vtanh.f32 %v250_v31 }
 0x5fe   :  { %v262_v37 = vpop.permute.xlu1 %261 }
 0x5ff   :  { %v704_v32 = vpop.eup %703  ;;  %v264_v38 = vmul.f32 %v824_v9, %v262_v37 }
 0x600   :  { %253 = vrot.lane.b32.xlu2 %v704_v32, %s773_s25 }
 0x601   :  { %v265_v39 = vadd.f32 %v830_v12, %v264_v38 }
 0x65a   :  { %v254_v33 = vpop.permute.xlu2 %253 }
 0x65b   :  { %v256_v34 = vmul.f32 %v254_v33, %v237_v27 }
 0x65d   :  { %267 = vrot.lane.b32.xlu0 %v256_v34, %s774_s1 }
 0x6cf   :  { %v268_v36 = vpop.permute.xlu0 %267 }
 0x6d0   :  { %656 = vmatmul.msk.f32.vlgmr.msra.gmra.mxu3 %vm22_vm0, %v268_v36 }
 0x753   :  { %v288_v40 = vpop.f32.mrf.mxu3 }
 0x754   :  { %v291_v41 = vadd.f32 %v288_v40, %v265_v39 }
 0x756   :  { %705 = vtanh.f32 %v291_v41  ;;  %v657_v43 = vmul.f32 -1.442695, %v291_v41 }
 0x758   :  { %707 = vpow2.f32 %v657_v43 }
 0x75c   :  { %v706_v42 = vpop.eup %705 }
 0x75d   :  { %314 = vrot.lane.b32.xlu2 %v706_v42, %s773_s25 }
 0x75e   :  { %v708_v44 = vpop.eup %707 }
 0x75f   :  { %v295_v45 = vadd.f32 1.0, %v708_v44 }
 0x761   :  { %709 = vrcp.f32 %v295_v45  ;;  %v307_v51 = vand.u32 2147483648, %v295_v45  ;;  %vm301_vm14 = vweird.f32 %v295_v45  ;;  %v305_v52 = vand.u32 2147483647, %v295_v45 }
 0x763   :  { %v308_v54 = vor.u32 1.1754944e-38, %v307_v51  ;;  %vm306_vm1 = vcmp.eq.f32.partialorder %v305_v52, 8.507059e+37 }
 0x767   :  { %v710_v46 = vpop.eup %709 }
 0x768   :  { %v297_v47 = vmul.f32 %v710_v46, %v295_v45  ;;  %vm302_vm13 = vweird.f32 %v710_v46 }
 0x769   :  { %vm303_vm15 = vmor %vm301_vm14, %vm302_vm13 }
 0x76a   :  { %v298_v48 = vsub.f32 1.0, %v297_v47 }
 0x76c   :  { %v299_v49 = vmul.f32 %v710_v46, %v298_v48 }
 0x76e   :  { %v300_v50 = vadd.f32 %v710_v46, %v299_v49 }
 0x770   :  { %v304_v53 = vsel %vm303_vm15, %v710_v46, %v300_v50 }
 0x771   :  { %v309_v56 = vsel %vm306_vm1, %v308_v54, %v304_v53  ;;  %v664_v54 = vld [vmem:[%s913_s0 + $0x30] sm:$0xff] }
 0x772   :  { %v312_v59 = vmul.f32 %v309_v56, %v250_v31 }
 0x7b7   :  { %v315_v55 = vpop.permute.xlu2 %314 }
 0x7b8   :  { %v317_v57 = vmul.f32 %v315_v55, %v309_v56 }
 0x7ba   :  { %319 = vrot.lane.b32.xlu0 %v317_v57, %s773_s25 }
 0x7c2   :  { %333 = vperm.xlu0 %676, %v658_v58  }
 0x82c   :  { %v320_v60 = vpop.permute.xlu0 %319 }
 0x82d   :  { %v322_v61 = vadd.f32 %v320_v60, %v312_v59 }
 0x82f   :  { %711 = vtanh.f32 %v322_v61 }
 0x834   :  { %v334_v2 = vpop.permute.xlu0 %333 }
 0x835   :  { %v712_v62 = vpop.eup %711  ;;  %v336_v3 = vmul.f32 %v824_v9, %v334_v2 }
 0x836   :  { %325 = vrot.lane.b32.xlu1 %v712_v62, %s773_s25 }
 0x837   :  { %v337_v4 = vadd.f32 %v830_v12, %v336_v3 }
 0x8a8   :  { %v326_v63 = vpop.permute.xlu1 %325 }
 0x8a9   :  { %v328_v0 = vmul.f32 %v326_v63, %v309_v56 }
 0x8ab   :  { %339 = vrot.lane.b32.xlu2 %v328_v0, %s774_s1 }
 0x905   :  { %v340_v1 = vpop.permute.xlu2 %339 }
 0x906   :  { %659 = vmatmul.msk.f32.vlgmr.msrb.gmra.mxu0 %vm22_vm0, %v340_v1 }
 0x983   :  { %v360_v5 = vpop.f32.mrf.mxu0 }
 0x984   :  { %v363_v6 = vadd.f32 %v360_v5, %v337_v4 }
 0x986   :  { %713 = vtanh.f32 %v363_v6  ;;  %v660_v8 = vmul.f32 -1.442695, %v363_v6 }
 0x988   :  { %715 = vpow2.f32 %v660_v8 }
 0x98c   :  { %v714_v7 = vpop.eup %713 }
 0x98d   :  { %386 = vrot.lane.b32.xlu1 %v714_v7, %s773_s25 }
 0x98e   :  { %v716_v10 = vpop.eup %715 }
 0x98f   :  { %v367_v11 = vadd.f32 1.0, %v716_v10 }
 0x991   :  { %717 = vrcp.f32 %v367_v11  ;;  %v379_v18 = vand.u32 2147483648, %v367_v11  ;;  %vm373_vm3 = vweird.f32 %v367_v11  ;;  %v377_v19 = vand.u32 2147483647, %v367_v11 }
 0x993   :  { %v380_v21 = vor.u32 1.1754944e-38, %v379_v18  ;;  %vm378_vm5 = vcmp.eq.f32.partialorder %v377_v19, 8.507059e+37 }
 0x997   :  { %v718_v13 = vpop.eup %717 }
 0x998   :  { %v369_v14 = vmul.f32 %v718_v13, %v367_v11  ;;  %vm374_vm2 = vweird.f32 %v718_v13 }
 0x999   :  { %vm375_vm4 = vmor %vm373_vm3, %vm374_vm2 }
 0x99a   :  { %v370_v15 = vsub.f32 1.0, %v369_v14 }
 0x99c   :  { %v371_v16 = vmul.f32 %v718_v13, %v370_v15 }
 0x99e   :  { %v372_v17 = vadd.f32 %v718_v13, %v371_v16 }
 0x9a0   :  { %v376_v20 = vsel %vm375_vm4, %v718_v13, %v372_v17 }
 0x9a1   :  { %v381_v23 = vsel %vm378_vm5, %v380_v21, %v376_v20  ;;  %v667_v21 = vld [vmem:[%s913_s0 + $0x38] sm:$0xff]  ;;  %s775_s0 = smov 96  }
 0x9a2   :  { %v384_v26 = vmul.f32 %v381_v23, %v322_v61 }
 0x9ff   :  { %v387_v22 = vpop.permute.xlu1 %386 }
 0xa00   :  { %v389_v24 = vmul.f32 %v387_v22, %v381_v23 }
 0xa02   :  { %391 = vrot.lane.b32.xlu2 %v389_v24, %s773_s25 }
 0xa0a   :  { %405 = vperm.xlu2 %677, %v661_v25  }
 0xa5c   :  { %v392_v27 = vpop.permute.xlu2 %391 }
 0xa5d   :  { %v394_v28 = vadd.f32 %v392_v27, %v384_v26 }
 0xa5f   :  { %719 = vtanh.f32 %v394_v28 }
 0xa64   :  { %v406_v33 = vpop.permute.xlu2 %405 }
 0xa65   :  { %v720_v29 = vpop.eup %719  ;;  %v408_v34 = vmul.f32 %v824_v9, %v406_v33 }
 0xa66   :  { %397 = vrot.lane.b32.xlu0 %v720_v29, %s773_s25 }
 0xa67   :  { %v409_v35 = vadd.f32 %v830_v12, %v408_v34 }
 0xad8   :  { %v398_v30 = vpop.permute.xlu0 %397 }
 0xad9   :  { %v400_v31 = vmul.f32 %v398_v30, %v381_v23 }
 0xadb   :  { %411 = vrot.lane.b32.xlu1 %v400_v31, %s774_s1 }
 0xb4d   :  { %v412_v32 = vpop.permute.xlu1 %411 }
 0xb4e   :  { %662 = vmatmul.msk.f32.vlgmr.msrb.gmra.mxu1 %vm22_vm0, %v412_v32 }
 0xbcb   :  { %v432_v36 = vpop.f32.mrf.mxu1 }
 0xbcc   :  { %v435_v37 = vadd.f32 %v432_v36, %v409_v35 }
 0xbce   :  { %721 = vtanh.f32 %v435_v37  ;;  %v663_v39 = vmul.f32 -1.442695, %v435_v37 }
 0xbd0   :  { %723 = vpow2.f32 %v663_v39 }
 0xbd4   :  { %v722_v38 = vpop.eup %721 }
 0xbd5   :  { %458 = vrot.lane.b32.xlu0 %v722_v38, %s773_s25 }
 0xbd6   :  { %v724_v40 = vpop.eup %723 }
 0xbd7   :  { %v439_v41 = vadd.f32 1.0, %v724_v40 }
 0xbd9   :  { %725 = vrcp.f32 %v439_v41  ;;  %v451_v47 = vand.u32 2147483648, %v439_v41  ;;  %vm445_vm7 = vweird.f32 %v439_v41  ;;  %v449_v48 = vand.u32 2147483647, %v439_v41 }
 0xbdb   :  { %v452_v50 = vor.u32 1.1754944e-38, %v451_v47  ;;  %vm450_vm9 = vcmp.eq.f32.partialorder %v449_v48, 8.507059e+37 }
 0xbdf   :  { %v726_v42 = vpop.eup %725 }
 0xbe0   :  { %v441_v43 = vmul.f32 %v726_v42, %v439_v41  ;;  %vm446_vm6 = vweird.f32 %v726_v42 }
 0xbe1   :  { %vm447_vm8 = vmor %vm445_vm7, %vm446_vm6 }
 0xbe2   :  { %v442_v44 = vsub.f32 1.0, %v441_v43 }
 0xbe4   :  { %v443_v45 = vmul.f32 %v726_v42, %v442_v44 }
 0xbe6   :  { %v444_v46 = vadd.f32 %v726_v42, %v443_v45 }
 0xbe8   :  { %v448_v49 = vsel %vm447_vm8, %v726_v42, %v444_v46 }
 0xbe9   :  { %v453_v52 = vsel %vm450_vm9, %v452_v50, %v448_v49 }
 0xbea   :  { %v456_v55 = vmul.f32 %v453_v52, %v394_v28 }
 0xc47   :  { %v459_v51 = vpop.permute.xlu0 %458 }
 0xc48   :  { %v461_v53 = vmul.f32 %v459_v51, %v453_v52 }
 0xc4a   :  { %463 = vrot.lane.b32.xlu1 %v461_v53, %s773_s25 }
 0xc52   :  { %477 = vperm.xlu1 %678, %v664_v54  }
 0xcbc   :  { %v464_v56 = vpop.permute.xlu1 %463 }
 0xcbd   :  { %v466_v57 = vadd.f32 %v464_v56, %v456_v55 }
 0xcbf   :  { %727 = vtanh.f32 %v466_v57 }
 0xcc4   :  { %v478_v62 = vpop.permute.xlu1 %477 }
 0xcc5   :  { %v728_v58 = vpop.eup %727  ;;  %v480_v63 = vmul.f32 %v824_v9, %v478_v62 }
 0xcc6   :  { %469 = vrot.lane.b32.xlu2 %v728_v58, %s773_s25 }
 0xcc7   :  { %v481_v0 = vadd.f32 %v830_v12, %v480_v63 }
 0xd20   :  { %v470_v59 = vpop.permute.xlu2 %469 }
 0xd21   :  { %v472_v60 = vmul.f32 %v470_v59, %v453_v52 }
 0xd23   :  { %483 = vrot.lane.b32.xlu0 %v472_v60, %s774_s1 }
 0xd95   :  { %v484_v61 = vpop.permute.xlu0 %483 }
 0xd96   :  { %665 = vmatmul.msk.f32.vlgmr.msrb.gmra.mxu2 %vm22_vm0, %v484_v61 }
 0xe19   :  { %v504_v1 = vpop.f32.mrf.mxu2 }
 0xe1a   :  { %v507_v2 = vadd.f32 %v504_v1, %v481_v0 }
 0xe1c   :  { %729 = vtanh.f32 %v507_v2  ;;  %v666_v4 = vmul.f32 -1.442695, %v507_v2 }
 0xe1e   :  { %731 = vpow2.f32 %v666_v4 }
 0xe22   :  { %v730_v3 = vpop.eup %729 }
 0xe23   :  { %530 = vrot.lane.b32.xlu2 %v730_v3, %s773_s25 }
 0xe24   :  { %v732_v5 = vpop.eup %731 }
 0xe25   :  { %v511_v6 = vadd.f32 1.0, %v732_v5 }
 0xe27   :  { %733 = vrcp.f32 %v511_v6  ;;  %v523_v14 = vand.u32 2147483648, %v511_v6  ;;  %vm517_vm11 = vweird.f32 %v511_v6  ;;  %v521_v15 = vand.u32 2147483647, %v511_v6 }
 0xe29   :  { %v524_v17 = vor.u32 1.1754944e-38, %v523_v14  ;;  %vm522_vm13 = vcmp.eq.f32.partialorder %v521_v15, 8.507059e+37 }
 0xe2d   :  { %v734_v7 = vpop.eup %733 }
 0xe2e   :  { %v513_v8 = vmul.f32 %v734_v7, %v511_v6  ;;  %vm518_vm10 = vweird.f32 %v734_v7 }
 0xe2f   :  { %vm519_vm12 = vmor %vm517_vm11, %vm518_vm10 }
 0xe30   :  { %v514_v10 = vsub.f32 1.0, %v513_v8 }
 0xe32   :  { %v515_v11 = vmul.f32 %v734_v7, %v514_v10 }
 0xe34   :  { %v516_v13 = vadd.f32 %v734_v7, %v515_v11 }
 0xe36   :  { %v520_v16 = vsel %vm519_vm12, %v734_v7, %v516_v13 }
 0xe37   :  { %v525_v19 = vsel %vm522_vm13, %v524_v17, %v520_v16 }
 0xe38   :  { %v528_v22 = vmul.f32 %v525_v19, %v466_v57 }
 0xe7d   :  { %v531_v18 = vpop.permute.xlu2 %530 }
 0xe7e   :  { %v533_v20 = vmul.f32 %v531_v18, %v525_v19 }
 0xe80   :  { %535 = vrot.lane.b32.xlu0 %v533_v20, %s773_s25 }
 0xe88   :  { %549 = vperm.xlu0 %676, %v667_v21  }
 0xef2   :  { %v536_v23 = vpop.permute.xlu0 %535 }
 0xef3   :  { %v538_v24 = vadd.f32 %v536_v23, %v528_v22 }
 0xef5   :  { %735 = vtanh.f32 %v538_v24 }
 0xefa   :  { %v550_v29 = vpop.permute.xlu0 %549 }
 0xefb   :  { %v736_v25 = vpop.eup %735  ;;  %v552_v30 = vmul.f32 %v824_v9, %v550_v29 }
 0xefc   :  { %541 = vrot.lane.b32.xlu1 %v736_v25, %s773_s25 }
 0xefd   :  { %v553_v31 = vadd.f32 %v830_v12, %v552_v30 }
 0xf6e   :  { %v542_v26 = vpop.permute.xlu1 %541 }
 0xf6f   :  { %v544_v27 = vmul.f32 %v542_v26, %v525_v19 }
 0xf71   :  { %555 = vrot.lane.b32.xlu2 %v544_v27, %s774_s1 }
 0xfcb   :  { %v556_v28 = vpop.permute.xlu2 %555 }
 0xfcc   :  { %668 = vmatmul.msk.f32.vlgmr.msrb.gmra.mxu3 %vm22_vm0, %v556_v28 }
0x104f   :  { %v576_v32 = vpop.f32.mrf.mxu3 }
0x1050   :  { %v579_v33 = vadd.f32 %v576_v32, %v553_v31 }
0x1052   :  { %737 = vtanh.f32 %v579_v33  ;;  %v669_v35 = vmul.f32 -1.442695, %v579_v33 }
0x1054   :  { %739 = vpow2.f32 %v669_v35 }
0x1058   :  { %v738_v34 = vpop.eup %737 }
0x1059   :  { %602 = vrot.lane.b32.xlu1 %v738_v34, %s773_s25 }
0x105a   :  { %v740_v36 = vpop.eup %739 }
0x105b   :  { %v583_v37 = vadd.f32 1.0, %v740_v36 }
0x105d   :  { %741 = vrcp.f32 %v583_v37  ;;  %v595_v9 = vand.u32 2147483648, %v583_v37  ;;  %vm589_vm15 = vweird.f32 %v583_v37  ;;  %v593_v12 = vand.u32 2147483647, %v583_v37 }
0x105f   :  { %v596_v44 = vor.u32 1.1754944e-38, %v595_v9  ;;  %vm594_vm2 = vcmp.eq.f32.partialorder %v593_v12, 8.507059e+37 }
0x1063   :  { %v742_v38 = vpop.eup %741 }
0x1064   :  { %v585_v39 = vmul.f32 %v742_v38, %v583_v37  ;;  %vm590_vm14 = vweird.f32 %v742_v38 }
0x1065   :  { %vm591_vm1 = vmor %vm589_vm15, %vm590_vm14 }
0x1066   :  { %v586_v40 = vsub.f32 1.0, %v585_v39 }
0x1068   :  { %v587_v41 = vmul.f32 %v742_v38, %v586_v40 }
0x106a   :  { %v588_v42 = vadd.f32 %v742_v38, %v587_v41 }
0x106c   :  { %v592_v43 = vsel %vm591_vm1, %v742_v38, %v588_v42 }
0x106d   :  { %v597_v46 = vsel %vm594_vm2, %v596_v44, %v592_v43 }
0x106e   :  { %v600_v48 = vmul.f32 %v597_v46, %v538_v24 }
0x10cb   :  { %v603_v45 = vpop.permute.xlu1 %602 }
0x10cc   :  { %v605_v47 = vmul.f32 %v603_v45, %v597_v46 }
0x10ce   :  { %607 = vrot.lane.b32.xlu2 %v605_v47, %s773_s25 }
0x1128   :  { %v608_v49 = vpop.permute.xlu2 %607 }
0x1129   :  { %v610_v50 = vadd.f32 %v608_v49, %v600_v48 }
0x112b   :  { %743 = vtanh.f32 %v610_v50  ;;  %623 = vrot.lane.b32.xlu2 %v610_v50, %s775_s0 }
0x1131   :  { %v744_v51 = vpop.eup %743 }
0x1132   :  { %613 = vrot.lane.b32.xlu0 %v744_v51, %s773_s25 }
0x1185   :  { %v624_v52 = vpop.permute.xlu2 %623 }
0x1186   :  { %626 = vst.msk [vmem:[#allocation3] sm:$0xff] %vm22_vm0, %v624_v52 }
0x11a4   :  { %v614_v53 = vpop.permute.xlu0 %613 }
0x11a5   :  { %v616_v54 = vmul.f32 %v614_v53, %v597_v46 }
0x11a7   :  { %618 = vrot.lane.b32.xlu1 %v616_v54, %s774_s1 }
0x1219   :  { %v619_v55 = vpop.permute.xlu1 %618 }
0x121a   :  { %621 = vst.msk [vmem:[#allocation2] sm:$0xff] %vm22_vm0, %v619_v55 }
0x121b   :  { %630 = vst.msk [vmem:[#allocation4] sm:$0xff] %vm22_vm0, %v619_v55 }
0x121c   :  { %641 = dma.vmem_to_hbm [thread:$0]  %s637_s17, 128, %s639_s20, [#allocation5]  }
0x121d   :  { %769 = dma.done.wait [#allocation5], 128  }
0x121e   :  { %770 = vsyncadd [#allocation5], 4294967168 }
0x121f   :  { %646 = vsyncpa [#allocation5], 1 }

</bundles_post_ra>
